<compile_context>
chip_gen: v7x
topology: tpu7x:2x2x1
jax: 0.10.0
libtpu: 0.0.40
codegen_flags: <defaults>
</compile_context>

<pallas_src>
import functools

import jax
import jax.numpy as jnp
from jax.experimental import pallas as pl
from jax.experimental.pallas import tpu as pltpu


def _round_up(n, m):
    return ((n + m - 1) // m) * m


def _pad2(a, rows, cols):
    return jnp.pad(a, ((0, rows - a.shape[0]), (0, cols - a.shape[1])))


def resblock_kernel(x_ref, wcat_ref, bcat_ref, w2_ref, b2_ref, w3_ref, b3_ref,
                    o_ref, *, mid_p):
    x = x_ref[...]                                                   # (tb, IN_P) bf16
    # fused first layer + residual: one MXU pass over x, f32 accumulation
    hc = jnp.dot(x, wcat_ref[...], preferred_element_type=jnp.float32) + bcat_ref[...]
    h = jnp.maximum(hc[:, :mid_p], 0.0)                              # encoder branch (f32)
    r = hc[:, mid_p:]                                                # residual branch (f32, no ReLU)
    # encoder: Linear -> ReLU -> Linear -> ReLU (bf16 MXU, f32 accumulate/epilogue)
    h = jnp.dot(h.astype(w2_ref.dtype), w2_ref[...],
                preferred_element_type=jnp.float32) + b2_ref[...]
    h = jnp.maximum(h, 0.0)
    y = jnp.dot(h.astype(w3_ref.dtype), w3_ref[...],
                preferred_element_type=jnp.float32) + b3_ref[...]
    y = jnp.maximum(y, 0.0)
    o_ref[...] = (y + r).astype(o_ref.dtype)                         # lane-dense bf16 store


def resblock_forward(x, params, *, block_rows=None):
    """x: (B, input_dim) float32. params: dict of (in,out) f32 weights and (1,out) f32 biases."""
    B, input_dim = x.shape
    mid_dim = params["w1"].shape[1]
    feature_dim = params["w3"].shape[1]

    # lane-dense (multiple-of-128) padded dims
    in_p = _round_up(input_dim, 128)
    mid_p = _round_up(mid_dim, 128)
    feat_p = _round_up(feature_dim, 128)

    # batch tiling: multiple of 16 (bf16 sublane packing); <=512 rows so grid pipelines at large B
    if block_rows is None:
        block_rows = min(512, _round_up(B, 16))
    block_rows = _round_up(block_rows, 16)
    b_pad = _round_up(B, block_rows)
    grid = (b_pad // block_rows,)

    # pack + zero-pad weights (bf16) and biases (f32); zero padding preserves the math exactly.
    wcat = jnp.concatenate(
        [_pad2(params["w1"], in_p, mid_p), _pad2(params["wr"], in_p, feat_p)],
        axis=1).astype(jnp.bfloat16)                                  # (IN_P, MID_P + FEAT_P)
    bcat = jnp.concatenate(
        [_pad2(params["b1"], 1, mid_p), _pad2(params["br"], 1, feat_p)],
        axis=1).astype(jnp.float32)                                   # (1, MID_P + FEAT_P)
    w2p = _pad2(params["w2"], mid_p, mid_p).astype(jnp.bfloat16)
    b2p = _pad2(params["b2"], 1, mid_p).astype(jnp.float32)
    w3p = _pad2(params["w3"], mid_p, feat_p).astype(jnp.bfloat16)
    b3p = _pad2(params["b3"], 1, feat_p).astype(jnp.float32)

    xp = jnp.pad(x, ((0, b_pad - B), (0, in_p - input_dim))).astype(jnp.bfloat16)

    kernel = functools.partial(resblock_kernel, mid_p=mid_p)

    # weights/biases: constant index_map -> resident across the whole grid (no per-step DMA)
    def rep(shape):
        return pl.BlockSpec(shape, lambda i: (0, 0))

    in_specs = [
        pl.BlockSpec((block_rows, in_p), lambda i: (i, 0)),           # x tile over batch
        rep((in_p, mid_p + feat_p)), rep((1, mid_p + feat_p)),        # wcat, bcat
        rep((mid_p, mid_p)),         rep((1, mid_p)),                 # w2, b2
        rep((mid_p, feat_p)),        rep((1, feat_p)),                # w3, b3
    ]
    out_spec = pl.BlockSpec((block_rows, feat_p), lambda i: (i, 0))

    out = pl.pallas_call(
        kernel,
        out_shape=jax.ShapeDtypeStruct((b_pad, feat_p), jnp.bfloat16),
        grid_spec=pltpu.PrefetchScalarGridSpec(
            num_scalar_prefetch=0,
            grid=grid,
            in_specs=in_specs,
            out_specs=out_spec,
        ),
        compiler_params=pltpu.CompilerParams(
            dimension_semantics=("parallel",),        # megacore-shard the batch axis (v7x: 2 TCs)
            vmem_limit_bytes=32 * 1024 * 1024,        # explicit; fits v7x's 64 MiB with headroom
        ),
    )(xp, wcat, bcat, w2p, b2p, w3p, b3p)

    return out[:B, :feature_dim].astype(x.dtype)


def init_params(key, input_dim, feature_dim, mid_dim, dtype=jnp.float32):
    ks = jax.random.split(key, 8)

    def lin(kw, kb, fan_in, fan_out):
        bound = 1.0 / jnp.sqrt(fan_in)
        w = jax.random.uniform(kw, (fan_in, fan_out), dtype, -bound, bound)
        b = jax.random.uniform(kb, (1, fan_out), dtype, -bound, bound)
        return w, b

    w1, b1 = lin(ks[0], ks[1], input_dim, mid_dim)
    w2, b2 = lin(ks[2], ks[3], mid_dim, mid_dim)
    w3, b3 = lin(ks[4], ks[5], mid_dim, feature_dim)
    wr, br = lin(ks[6], ks[7], input_dim, feature_dim)
    return dict(w1=w1, b1=b1, w2=w2, b2=b2, w3=w3, b3=b3, wr=wr, br=br)


def resblock_ref(x, p):
    h = jax.nn.relu(x @ p["w1"] + p["b1"])
    h = jax.nn.relu(h @ p["w2"] + p["b2"])
    y = jax.nn.relu(h @ p["w3"] + p["b3"])
    return y + (x @ p["wr"] + p["br"])


if __name__ == "__main__":
    key = jax.random.PRNGKey(0)
    batch, input_dim, feature_dim, mid_dim = 8, 32, 48, 64
    kx, kp = jax.random.split(key)
    x = jax.random.normal(kx, (batch, input_dim), jnp.float32)
    params = init_params(kp, input_dim, feature_dim, mid_dim)

    out = resblock_forward(x, params)
    out = jax.block_until_ready(out)

    ref = resblock_ref(x, params)
    assert out.shape == (batch, feature_dim)
    # bf16 datapath with f32 accumulation -> loose tolerance vs the f32 reference
    assert jnp.allclose(out, ref, atol=5e-2, rtol=5e-2), "mismatch vs pure-JAX reference"
    print("KERNEL_OK")
</pallas_src>

<mosaic_0001>
module attributes {stable_mosaic.version = 11 : i64} {
  func.func @resblock_kernel(%arg0: i32, %arg1: memref<16x128xbf16, #tpu.memory_space<vmem>>, %arg2: memref<128x256xbf16, #tpu.memory_space<vmem>>, %arg3: memref<1x256xf32, #tpu.memory_space<vmem>>, %arg4: memref<128x128xbf16, #tpu.memory_space<vmem>>, %arg5: memref<1x128xf32, #tpu.memory_space<vmem>>, %arg6: memref<128x128xbf16, #tpu.memory_space<vmem>>, %arg7: memref<1x128xf32, #tpu.memory_space<vmem>>, %arg8: memref<16x128xbf16, #tpu.memory_space<vmem>>) attributes {dimension_semantics = [#tpu.dimension_semantics<parallel>], iteration_bounds = array<i64: 1>, scalar_prefetch = 0 : i64, scratch_operands = 0 : i64, tpu.core_type = #tpu.core_type<tc>, window_params = [{transform_indices = @transform_0, window_bounds = array<i64: 16, 128>}, {pipeline_mode = #tpu.pipeline_mode<synchronous>, transform_indices = @transform_1, window_bounds = array<i64: 128, 256>}, {pipeline_mode = #tpu.pipeline_mode<synchronous>, transform_indices = @transform_2, window_bounds = array<i64: 1, 256>}, {pipeline_mode = #tpu.pipeline_mode<synchronous>, transform_indices = @transform_3, window_bounds = array<i64: 128, 128>}, {pipeline_mode = #tpu.pipeline_mode<synchronous>, transform_indices = @transform_4, window_bounds = array<i64: 1, 128>}, {pipeline_mode = #tpu.pipeline_mode<synchronous>, transform_indices = @transform_5, window_bounds = array<i64: 128, 128>}, {pipeline_mode = #tpu.pipeline_mode<synchronous>, transform_indices = @transform_6, window_bounds = array<i64: 1, 128>}, {transform_indices = @transform_7, window_bounds = array<i64: 16, 128>}]} {
    %c0 = arith.constant 0 : index
    %c0_0 = arith.constant 0 : index
    %0 = vector.load %arg1[%c0, %c0_0] : memref<16x128xbf16, #tpu.memory_space<vmem>>, vector<16x128xbf16>
    %c0_1 = arith.constant 0 : index
    %c0_2 = arith.constant 0 : index
    %1 = vector.load %arg2[%c0_1, %c0_2] : memref<128x256xbf16, #tpu.memory_space<vmem>>, vector<128x256xbf16>
    %cst = arith.constant dense<0.000000e+00> : vector<16x256xf32>
    %2 = tpu.matmul %0, %1, %cst {dimension_numbers = #tpu.dot_dimension_numbers<[1], [0], [0], [1], [0, 0, 1, 1], [], []>} : vector<16x128xbf16>, vector<128x256xbf16>, vector<16x256xf32> -> vector<16x256xf32>
    %c0_3 = arith.constant 0 : index
    %c0_4 = arith.constant 0 : index
    %3 = vector.load %arg3[%c0_3, %c0_4] : memref<1x256xf32, #tpu.memory_space<vmem>>, vector<1x256xf32>
    %4 = vector.broadcast %3 : vector<1x256xf32> to vector<16x256xf32>
    %5 = arith.addf %2, %4 : vector<16x256xf32>
    %6 = vector.extract_strided_slice %5 {offsets = [0, 0], sizes = [16, 128], strides = [1, 1]} : vector<16x256xf32> to vector<16x128xf32>
    %cst_5 = arith.constant 0.000000e+00 : f32
    %7 = vector.broadcast %cst_5 : f32 to vector<16x128xf32>
    %8 = arith.maximumf %6, %7 : vector<16x128xf32>
    %9 = vector.extract_strided_slice %5 {offsets = [0, 128], sizes = [16, 128], strides = [1, 1]} : vector<16x256xf32> to vector<16x128xf32>
    %10 = arith.truncf %8 : vector<16x128xf32> to vector<16x128xbf16>
    %c0_6 = arith.constant 0 : index
    %c0_7 = arith.constant 0 : index
    %11 = vector.load %arg4[%c0_6, %c0_7] : memref<128x128xbf16, #tpu.memory_space<vmem>>, vector<128x128xbf16>
    %cst_8 = arith.constant dense<0.000000e+00> : vector<16x128xf32>
    %12 = tpu.matmul %10, %11, %cst_8 {dimension_numbers = #tpu.dot_dimension_numbers<[1], [0], [0], [1], [0, 0, 1, 1], [], []>} : vector<16x128xbf16>, vector<128x128xbf16>, vector<16x128xf32> -> vector<16x128xf32>
    %c0_9 = arith.constant 0 : index
    %c0_10 = arith.constant 0 : index
    %13 = vector.load %arg5[%c0_9, %c0_10] : memref<1x128xf32, #tpu.memory_space<vmem>>, vector<1x128xf32>
    %14 = vector.broadcast %13 : vector<1x128xf32> to vector<16x128xf32>
    %15 = arith.addf %12, %14 : vector<16x128xf32>
    %cst_11 = arith.constant 0.000000e+00 : f32
    %16 = vector.broadcast %cst_11 : f32 to vector<16x128xf32>
    %17 = arith.maximumf %15, %16 : vector<16x128xf32>
    %18 = arith.truncf %17 : vector<16x128xf32> to vector<16x128xbf16>
    %c0_12 = arith.constant 0 : index
    %c0_13 = arith.constant 0 : index
    %19 = vector.load %arg6[%c0_12, %c0_13] : memref<128x128xbf16, #tpu.memory_space<vmem>>, vector<128x128xbf16>
    %cst_14 = arith.constant dense<0.000000e+00> : vector<16x128xf32>
    %20 = tpu.matmul %18, %19, %cst_14 {dimension_numbers = #tpu.dot_dimension_numbers<[1], [0], [0], [1], [0, 0, 1, 1], [], []>} : vector<16x128xbf16>, vector<128x128xbf16>, vector<16x128xf32> -> vector<16x128xf32>
    %c0_15 = arith.constant 0 : index
    %c0_16 = arith.constant 0 : index
    %21 = vector.load %arg7[%c0_15, %c0_16] : memref<1x128xf32, #tpu.memory_space<vmem>>, vector<1x128xf32>
    %22 = vector.broadcast %21 : vector<1x128xf32> to vector<16x128xf32>
    %23 = arith.addf %20, %22 : vector<16x128xf32>
    %cst_17 = arith.constant 0.000000e+00 : f32
    %24 = vector.broadcast %cst_17 : f32 to vector<16x128xf32>
    %25 = arith.maximumf %23, %24 : vector<16x128xf32>
    %26 = arith.addf %25, %9 : vector<16x128xf32>
    %27 = arith.truncf %26 : vector<16x128xf32> to vector<16x128xbf16>
    %c0_18 = arith.constant 0 : index
    %c0_19 = arith.constant 0 : index
    %28 = vector.load %arg8[%c0_18, %c0_19] : memref<16x128xbf16, #tpu.memory_space<vmem>>, vector<16x128xbf16>
    tpu.vector_store %arg8[%c0_18, %c0_19], %27 {strides = array<i32>} : memref<16x128xbf16, #tpu.memory_space<vmem>>, vector<16x128xbf16>,
    return
  }
  func.func @transform_0(%arg0: i32) -> (i32, i32) {
    %c0_i32 = arith.constant 0 : i32
    %c0_i32_0 = arith.constant 0 : i32
    return %arg0, %c0_i32 : i32, i32
  }
  func.func @transform_1(%arg0: i32) -> (i32, i32) {
    %c0_i32 = arith.constant 0 : i32
    %c0_i32_0 = arith.constant 0 : i32
    %c0_i32_1 = arith.constant 0 : i32
    return %c0_i32, %c0_i32_0 : i32, i32
  }
  func.func @transform_2(%arg0: i32) -> (i32, i32) {
    %c0_i32 = arith.constant 0 : i32
    %c0_i32_0 = arith.constant 0 : i32
    %c0_i32_1 = arith.constant 0 : i32
    return %c0_i32, %c0_i32_0 : i32, i32
  }
  func.func @transform_3(%arg0: i32) -> (i32, i32) {
    %c0_i32 = arith.constant 0 : i32
    %c0_i32_0 = arith.constant 0 : i32
    %c0_i32_1 = arith.constant 0 : i32
    return %c0_i32, %c0_i32_0 : i32, i32
  }
  func.func @transform_4(%arg0: i32) -> (i32, i32) {
    %c0_i32 = arith.constant 0 : i32
    %c0_i32_0 = arith.constant 0 : i32
    %c0_i32_1 = arith.constant 0 : i32
    return %c0_i32, %c0_i32_0 : i32, i32
  }
  func.func @transform_5(%arg0: i32) -> (i32, i32) {
    %c0_i32 = arith.constant 0 : i32
    %c0_i32_0 = arith.constant 0 : i32
    %c0_i32_1 = arith.constant 0 : i32
    return %c0_i32, %c0_i32_0 : i32, i32
  }
  func.func @transform_6(%arg0: i32) -> (i32, i32) {
    %c0_i32 = arith.constant 0 : i32
    %c0_i32_0 = arith.constant 0 : i32
    %c0_i32_1 = arith.constant 0 : i32
    return %c0_i32, %c0_i32_0 : i32, i32
  }
  func.func @transform_7(%arg0: i32) -> (i32, i32) {
    %c0_i32 = arith.constant 0 : i32
    %c0_i32_0 = arith.constant 0 : i32
    return %arg0, %c0_i32 : i32, i32
  }
}

</mosaic_0001>

<bundles_post_ra>
// kernel: tpu_custom_call.1
= control target key start
LH: loop header
LB: loop body
LE: loop exit
PB: predicated region body
PF: predicated region fallthrough
CT: control target
= control target key end

     0   :  { %12 = vsyncpa [#allocation3], 0  ;;  %s936_s0 = inlined_call_operand.hbm [shape: bf16[16,128], index: 0, kind: input, shape index: {}]   ;;  %s937_s1 = inlined_call_operand.hbm [shape: bf16[128,256], index: 1, kind: input, shape index: {}]   ;;  %s938_s2 = inlined_call_operand.vmem [shape: f32[1,256], index: 2, kind: input, shape index: {}]   ;;  %s939_s3 = inlined_call_operand.hbm [shape: bf16[128,128], index: 3, kind: input, shape index: {}]   ;;  %s940_s4 = inlined_call_operand.vmem [shape: f32[1,128], index: 4, kind: input, shape index: {}]   ;;  %s941_s5 = inlined_call_operand.hbm [shape: bf16[128,128], index: 5, kind: input, shape index: {}]   ;;  %s942_s6 = inlined_call_operand.vmem [shape: f32[1,128], index: 6, kind: input, shape index: {}]   ;;  %s943_s7 = inlined_call_operand.hbm [shape: bf16[16,128], index: 7, kind: output, shape index: {}]  }
   0x1   :  { %13 = vsyncpa [#allocation6], 0 }
   0x2   :  { %14 = vsyncpa [#allocation9], 0 }
   0x3   :  { %15 = vsyncpa [#allocation4], 0  ;;  %s778_s24 = smov [#allocation5]   ;;  %s660_s28 = scalar_lea.hbm %s937_s1, 2048 }
   0x4   :  { %s33_s25 = sshll.u32 %s778_s24, 4  ;;  %p661_p0 = scmp.ne.s32.totalorder %s937_s1, %s660_s28  ;;  %s34_s25 = int_to_ptr.vmem [resolvable:$true] %s33_s25 }
   0x5   :  { %p664_p1 = scmp.lt.u32.totalorder %s660_s28, %s937_s1 }
   0x7   :  { %p666_p2 = pnand %p664_p1, %p661_p0 }
   0x9   :  { %669 = shalt.err (!%p666_p2)
}
   0xa   :  { %s670_s10 = scalar_lea.vmem %s34_s25, 2048  ;;  %p675_p4 = scmp.lt.s32.totalorder %s34_s25, %s34_s25 }
   0xb   :  { %p671_p3 = scmp.ne.s32.totalorder %s34_s25, %s670_s10  ;;  %p676_p5 = scmp.lt.s32.totalorder %s670_s10, %s670_s10 }
   0xd   :  { %p677_p6 = por %p676_p5, %p675_p4 }
   0xf   :  { %p678_p7 = pnand %p677_p6, %p671_p3 }
  0x11   :  { %681 = shalt.err (!%p678_p7)
}
  0x12   :  { %s779_s11 = smov 128   ;;  %s780_s12 = smov 8  }
  0x13   :  { %39 = dma.hbm_to_vmem [thread:$0]  %s937_s1, 2048, %s34_s25, [#allocation6], %s779_s11, %s779_s11, %s780_s12  }
  0x14   :  { %s781_s15 = smov [#allocation2]   ;;  %s682_s19 = scalar_lea.hbm %s936_s0, 128 }
  0x15   :  { %s21_s16 = sshll.u32 %s781_s15, 4  ;;  %p683_p8 = scmp.ne.s32.totalorder %s936_s0, %s682_s19  ;;  %s22_s16 = int_to_ptr.vmem [resolvable:$true] %s21_s16 }
  0x16   :  { %p686_p9 = scmp.lt.u32.totalorder %s682_s19, %s936_s0 }
  0x18   :  { %p688_p10 = pnand %p686_p9, %p683_p8 }
  0x1a   :  { %691 = shalt.err (!%p688_p10)
}
  0x1b   :  { %s692_s24 = scalar_lea.vmem %s22_s16, 128  ;;  %p697_p12 = scmp.lt.s32.totalorder %s22_s16, %s22_s16 }
  0x1c   :  { %p693_p11 = scmp.ne.s32.totalorder %s22_s16, %s692_s24  ;;  %p698_p13 = scmp.lt.s32.totalorder %s692_s24, %s692_s24 }
  0x1e   :  { %p699_p0 = por %p698_p13, %p697_p12 }
  0x20   :  { %p700_p1 = pnand %p699_p0, %p693_p11 }
  0x22   :  { %703 = shalt.err (!%p700_p1)
}
  0x23   :  { %s782_s1 = smov 64   ;;  %s783_s25 = smov 4  }
  0x24   :  { %27 = dma.hbm_to_vmem [thread:$0]  %s936_s0, 128, %s22_s16, [#allocation3], %s782_s1, %s782_s1, %s783_s25  }
  0x25   :  { %s784_s28 = smov [#allocation7]   ;;  %s785_s30 = smov [#allocation8]  }
  0x26   :  { %s47_s29 = sshll.u32 %s784_s28, 4  ;;  %s61_s8 = sshll.u32 %s785_s30, 4  ;;  %s48_s29 = int_to_ptr.vmem [resolvable:$true] %s47_s29  ;;  %s857_s8 = int_to_ptr.vmem [resolvable:$true] %s61_s8 }
  0x27   :  { %s704_s11 = scalar_lea.hbm %s939_s3, 1024 }
  0x28   :  { %p705_p2 = scmp.ne.s32.totalorder %s939_s3, %s704_s11  ;;  %p708_p3 = scmp.lt.u32.totalorder %s704_s11, %s939_s3 }
  0x2a   :  { %p710_p4 = pnand %p708_p3, %p705_p2 }
  0x2c   :  { %713 = shalt.err (!%p710_p4)
}
  0x2d   :  { %s714_s0 = scalar_lea.vmem %s48_s29, 1024  ;;  %p719_p6 = scmp.lt.s32.totalorder %s48_s29, %s48_s29 }
  0x2e   :  { %p715_p5 = scmp.ne.s32.totalorder %s48_s29, %s714_s0  ;;  %p720_p7 = scmp.lt.s32.totalorder %s714_s0, %s714_s0 }
  0x30   :  { %p721_p8 = por %p720_p7, %p719_p6 }
  0x32   :  { %p722_p9 = pnand %p721_p8, %p715_p5 }
  0x34   :  { %725 = shalt.err (!%p722_p9)
}
  0x35   :  { %53 = dma.hbm_to_vmem [thread:$0]  %s939_s3, 1024, %s48_s29, [#allocation6], %s782_s1, %s782_s1, %s783_s25  }
  0x36   :  { %s726_s20 = scalar_lea.hbm %s941_s5, 1024 }
  0x37   :  { %p727_p10 = scmp.ne.s32.totalorder %s941_s5, %s726_s20  ;;  %p730_p11 = scmp.lt.u32.totalorder %s726_s20, %s941_s5 }
  0x39   :  { %p732_p12 = pnand %p730_p11, %p727_p10 }
  0x3b   :  { %735 = shalt.err (!%p732_p12)
}
  0x3c   :  { %s736_s26 = scalar_lea.vmem %s857_s8, 1024  ;;  %p741_p0 = scmp.lt.s32.totalorder %s857_s8, %s857_s8 }
  0x3d   :  { %p737_p13 = scmp.ne.s32.totalorder %s857_s8, %s736_s26  ;;  %p742_p1 = scmp.lt.s32.totalorder %s736_s26, %s736_s26 }
  0x3f   :  { %p743_p2 = por %p742_p1, %p741_p0 }
  0x41   :  { %p744_p3 = pnand %p743_p2, %p737_p13 }
  0x43   :  { %747 = shalt.err (!%p744_p3)
}
  0x44   :  { %67 = dma.hbm_to_vmem [thread:$0]  %s941_s5, 1024, %s857_s8, [#allocation9], %s782_s1, %s782_s1, %s783_s25  }
  0x45   :  { %770 = dma.done.wait [#allocation3], 128  }
  0x46   :  { %771 = vsyncadd [#allocation3], 4294967168 }
  0x47   :  { %772 = dma.done.wait [#allocation6], 3072  }
  0x48   :  { %773 = vsyncadd [#allocation6], 4294964224 }
  0x49   :  { %774 = dma.done.wait [#allocation9], 1024  }
  0x4a   :  { %775 = vsyncadd [#allocation9], 4294966272  ;;  %v786_v0 = vmov 0   ;;  %v787_v1 = vmov 0.0   ;;  %v619_v2 = vld [vmem:[#allocation5 + $0x4] ss:$8 sps:$4 sm:$0xff]   ;;  %v103_v33 = vlaneseq }
  0x4b   :  { %231 = vmatprep.mubr.bf16.mxu0 %v786_v0  ;;  %567 = vmatprep.subr.bf16.mxu1 %v787_v1  ;;  %v621_v3 = vld [vmem:[#allocation5] ss:$8 sps:$4 sm:$0xff]   ;;  %v622_v4 = vld [vmem:[#allocation5 + $0x14] ss:$8 sps:$4 sm:$0xff]   ;;  %v624_v5 = vld [vmem:[#allocation5 + $0x10] ss:$8 sps:$4 sm:$0xff]  }
  0x4c   :  { %199 = vmatprep.subr.bf16.mxu0 %v619_v2  ;;  %v625_v6 = vld [vmem:[#allocation5 + $0x24] ss:$8 sps:$4 sm:$0xff]   ;;  %v627_v7 = vld [vmem:[#allocation5 + $0x20] ss:$8 sps:$4 sm:$0xff]   ;;  %v628_v8 = vld [vmem:[#allocation5 + $0x34] ss:$8 sps:$4 sm:$0xff]  }
  0x4d   :  { %200 = vmatpush1.bf16.msra.mxu0 %v621_v3  ;;  %v630_v9 = vld [vmem:[#allocation5 + $0x30] ss:$8 sps:$4 sm:$0xff]   ;;  %v631_v10 = vld [vmem:[#allocation5 + $0x44] ss:$8 sps:$4 sm:$0xff]   ;;  %v633_v13 = vld [vmem:[#allocation5 + $0x40] ss:$8 sps:$4 sm:$0xff]  }
  0x4e   :  { %201 = vmatprep.subr.bf16.mxu0 %v622_v4  ;;  %v644_v11 = vld [vmem:[#allocation7] sm:$0xff]   ;;  %v645_v12 = vld [vmem:[#allocation7 + $0x8] sm:$0xff]   ;;  %v634_v14 = vld [vmem:[#allocation5 + $0x54] ss:$8 sps:$4 sm:$0xff]   ;;  %vm788_vm0 = vmmov 0   ;;  %v104_v34 = vshrl.u32 %v103_v33, 7 }
  0x4f   :  { %568 = vmatpush3.bf16.msra.mxu1 %v644_v11  ;;  %v636_v15 = vld [vmem:[#allocation5 + $0x50] ss:$8 sps:$4 sm:$0xff]   ;;  %v637_v17 = vld [vmem:[#allocation5 + $0x64] ss:$8 sps:$4 sm:$0xff]   ;;  %v639_v19 = vld [vmem:[#allocation5 + $0x60] ss:$8 sps:$4 sm:$0xff]   ;;  %583 = vmatprep.mubr.msk.bf16.mxu1 %vm788_vm0, %v787_v1 }
  0x50   :  { %569 = vmatprep.subr.bf16.mxu1 %v787_v1  ;;  %v646_v16 = vld [vmem:[#allocation7 + $0x10] sm:$0xff]   ;;  %v647_v18 = vld [vmem:[#allocation7 + $0x18] sm:$0xff]   ;;  %v648_v21 = vld [vmem:[#allocation7 + $0x20] sm:$0xff]   ;;  %v105_v35 = vsub.s32 0, %v104_v34  ;;  %v109_v59 = vsub.s32 1, %v104_v34 }
  0x51   :  { %202 = vmatpush1.bf16.msra.mxu0 %v624_v5  ;;  %v640_v20 = vld [vmem:[#allocation5 + $0x74] ss:$8 sps:$4 sm:$0xff]   ;;  %v642_v22 = vld [vmem:[#allocation5 + $0x70] ss:$8 sps:$4 sm:$0xff]   ;;  %v649_v24 = vld [vmem:[#allocation7 + $0x28] sm:$0xff]  }
  0x52   :  { %203 = vmatprep.subr.bf16.mxu0 %v625_v6  ;;  %v643_v23 = vld [vmem:[#allocation2] sm:$0xff]   ;;  %v650_v25 = vld [vmem:[#allocation7 + $0x30] sm:$0xff]   ;;  %v652_v27 = vld [vmem:[#allocation8] sm:$0xff]  }
  0x53   :  { %570 = vmatpush3.bf16.msra.mxu1 %v645_v12  ;;  %v651_v26 = vld [vmem:[#allocation7 + $0x38] sm:$0xff]   ;;  %v653_v28 = vld [vmem:[#allocation8 + $0x8] sm:$0xff]   ;;  %v654_v29 = vld [vmem:[#allocation8 + $0x10] sm:$0xff]  }
  0x54   :  { %571 = vmatprep.subr.bf16.mxu1 %v787_v1  ;;  %v655_v30 = vld [vmem:[#allocation8 + $0x18] sm:$0xff]   ;;  %v656_v31 = vld [vmem:[#allocation8 + $0x20] sm:$0xff]   ;;  %v657_v32 = vld [vmem:[#allocation8 + $0x28] sm:$0xff]  }
  0x55   :  { %204 = vmatpush1.bf16.msra.mxu0 %v627_v7  ;;  %v101_v36 = vld [vmem:[%s938_s2] sm:$0x3]  ;;  %v658_v47 = vld [vmem:[#allocation8 + $0x30] sm:$0xff]  }
  0x56   :  { %205 = vmatprep.subr.bf16.mxu0 %v628_v8  ;;  %v106_v37 = vrot.slane %v101_v36, %v105_v35  ;;  %v659_v48 = vld [vmem:[#allocation8 + $0x38] sm:$0xff]   ;;  %v110_v61 = vrot.slane %v101_v36, %v109_v59 }
  0x57   :  { %572 = vmatpush3.bf16.msra.mxu1 %v646_v16  ;;  %v522_v49 = vld [vmem:[%s940_s4] ss:$0 sm:$0xff]  ;;  %s789_s4 = smov [#allocation10]  }
  0x58   :  { %573 = vmatprep.subr.bf16.mxu1 %v787_v1  ;;  %v531_v60 = vld [vmem:[%s942_s6] ss:$0 sm:$0xff]  ;;  %s491_s9 = sshll.u32 %s789_s4, 4  ;;  %s492_s9 = int_to_ptr.vmem [resolvable:$true] %s491_s9 }
  0x59   :  { %206 = vmatpush1.bf16.msra.mxu0 %v630_v9  ;;  %s748_s10 = scalar_lea.vmem %s492_s9, 128  ;;  %p753_p5 = scmp.lt.s32.totalorder %s492_s9, %s492_s9 }
  0x5a   :  { %207 = vmatprep.subr.bf16.mxu0 %v631_v10  ;;  %p749_p4 = scmp.ne.s32.totalorder %s492_s9, %s748_s10  ;;  %p754_p6 = scmp.lt.s32.totalorder %s748_s10, %s748_s10 }
  0x5b   :  { %574 = vmatpush3.bf16.msra.mxu1 %v647_v18 }
  0x5c   :  { %575 = vmatprep.subr.bf16.mxu1 %v787_v1  ;;  %p755_p7 = por %p754_p6, %p753_p5 }
  0x5d   :  { %208 = vmatpush1.bf16.msra.mxu0 %v633_v13 }
  0x5e   :  { %209 = vmatprep.subr.bf16.mxu0 %v634_v14  ;;  %p756_p8 = pnand %p755_p7, %p749_p4 }
  0x5f   :  { %576 = vmatpush3.bf16.msra.mxu1 %v648_v21 }
  0x60   :  { %577 = vmatprep.subr.bf16.mxu1 %v787_v1 }
  0x61   :  { %210 = vmatpush1.bf16.msra.mxu0 %v636_v15 }
  0x62   :  { %211 = vmatprep.subr.bf16.mxu0 %v637_v17 }
  0x63   :  { %578 = vmatpush3.bf16.msra.mxu1 %v649_v24 }
  0x64   :  { %579 = vmatprep.subr.bf16.mxu1 %v787_v1 }
  0x65   :  { %212 = vmatpush1.bf16.msra.mxu0 %v639_v19 }
  0x66   :  { %213 = vmatprep.subr.bf16.mxu0 %v640_v20 }
  0x67   :  { %580 = vmatpush3.bf16.msra.mxu1 %v650_v25 }
  0x68   :  { %581 = vmatprep.subr.bf16.mxu1 %v787_v1 }
  0x69   :  { %214 = vmatpush1.bf16.msra.mxu0 %v642_v22 }
  0x6a   :  { %587 = vmatprep.subr.bf16.mxu0 %v787_v1 }
  0x6b   :  { %582 = vmatpush3.bf16.msra.mxu1 %v651_v26 }
  0x6c   :  { %232 = vmatmul.mubr.bf16.vlgmr.msra.gmra.mrb[0].mxu0 %v643_v23 }
  0x6d   :  { %603 = vmatprep.mubr.msk.bf16.mxu0 %vm788_vm0, %v787_v1  ;;  %588 = vmatpush3.bf16.msra.mxu0 %v652_v27 }
  0x6e   :  { %589 = vmatprep.subr.bf16.mxu0 %v787_v1 }
  0x71   :  { %590 = vmatpush3.bf16.msra.mxu0 %v653_v28 }
  0x72   :  { %591 = vmatprep.subr.bf16.mxu0 %v787_v1 }
  0x75   :  { %592 = vmatpush3.bf16.msra.mxu0 %v654_v29 }
  0x76   :  { %593 = vmatprep.subr.bf16.mxu0 %v787_v1 }
  0x79   :  { %594 = vmatpush3.bf16.msra.mxu0 %v655_v30 }
  0x7a   :  { %595 = vmatprep.subr.bf16.mxu0 %v787_v1 }
  0x7d   :  { %596 = vmatpush3.bf16.msra.mxu0 %v656_v31 }
  0x7e   :  { %597 = vmatprep.subr.bf16.mxu0 %v787_v1 }
  0x81   :  { %598 = vmatpush3.bf16.msra.mxu0 %v657_v32 }
  0x82   :  { %599 = vmatprep.subr.bf16.mxu0 %v787_v1 }
  0x85   :  { %600 = vmatpush3.bf16.msra.mxu0 %v658_v47 }
  0x86   :  { %601 = vmatprep.subr.bf16.mxu0 %v787_v1 }
  0x89   :  { %602 = vmatpush3.bf16.msra.mxu0 %v659_v48 }
 0x13f   :  { %v233_v38 = vpop.f32.mrb[0].mxu0 }
 0x140   :  { %v234_v39 = vadd.f32 %v233_v38, %v106_v37  ;;  %v235_v40 = vpop.f32.mrb[1].mxu0 }
 0x141   :  { %v237_v41 = vpop.f32.mrb[2].mxu0  ;;  %v236_v2 = vadd.f32 %v235_v40, %v110_v61 }
 0x142   :  { %v238_v42 = vadd.f32 %v237_v41, %v106_v37  ;;  %v239_v43 = vpop.f32.mrb[3].mxu0  ;;  %v242_v44 = vmax.f32 %v234_v39, 0.0 }
 0x143   :  { %v240_v6 = vadd.f32 %v239_v43, %v110_v61 }
 0x144   :  { %v243_v45 = vmax.f32 %v238_v42, 0.0 }
 0x146   :  { %v244_v46 = vpack.c.bf16 %v243_v45, %v242_v44 }
 0x148   :  { %584 = vmatmul.mubr.bf16.vlgmr.msra.gmra.mrb[0].mxu1 %v244_v46 }
 0x21b   :  { %v350_v50 = vpop.f32.mrb[0].mxu1 }
 0x21c   :  { %v351_v51 = vadd.f32 %v522_v49, %v350_v50  ;;  %v585_v52 = vpop.f32.mrb[1].mxu1 }
 0x21d   :  { %v353_v53 = vpop.f32.mrb[2].mxu1 }
 0x21e   :  { %v354_v54 = vadd.f32 %v522_v49, %v353_v53  ;;  %v586_v55 = vpop.f32.mrb[3].mxu1  ;;  %v357_v56 = vmax.f32 %v351_v51, 0.0 }
 0x220   :  { %v358_v57 = vmax.f32 %v354_v54, 0.0 }
 0x222   :  { %v359_v58 = vpack.c.bf16 %v358_v57, %v357_v56 }
 0x224   :  { %604 = vmatmul.mubr.bf16.vlgmr.msra.gmra.mrb[4].mxu0 %v359_v58 }
 0x2f7   :  { %v465_v62 = vpop.f32.mrb[4].mxu0 }
 0x2f8   :  { %v466_v63 = vadd.f32 %v531_v60, %v465_v62  ;;  %v605_v0 = vpop.f32.mrb[5].mxu0 }
 0x2f9   :  { %v468_v1 = vpop.f32.mrb[6].mxu0 }
 0x2fa   :  { %v472_v3 = vmax.f32 %v466_v63, 0.0  ;;  %v469_v4 = vadd.f32 %v531_v60, %v468_v1  ;;  %v606_v5 = vpop.f32.mrb[7].mxu0 }
 0x2fc   :  { %v474_v7 = vadd.f32 %v472_v3, %v236_v2  ;;  %v473_v8 = vmax.f32 %v469_v4, 0.0 }
 0x2fe   :  { %v475_v9 = vadd.f32 %v473_v8, %v240_v6 }
 0x300   :  { %v547_v10 = vpack.c.bf16 %v475_v9, %v474_v7 }
 0x302   :  { %548 = vst [vmem:[#allocation10] sm:$0xff] %v547_v10  }
 0x303   :  { %759 = shalt.err (!%p756_p8)
}
 0x304   :  { %s760_s12 = scalar_lea.hbm %s943_s7, 128 }
 0x305   :  { %p761_p9 = scmp.ne.s32.totalorder %s943_s7, %s760_s12  ;;  %p764_p10 = scmp.lt.u32.totalorder %s760_s12, %s943_s7 }
 0x307   :  { %p766_p11 = pnand %p764_p10, %p761_p9 }
 0x309   :  { %769 = shalt.err (!%p766_p11)
}
 0x30a   :  { %497 = dma.vmem_to_hbm [thread:$0]  %s492_s9, 128, %s943_s7, [#allocation4], %s782_s1, %s782_s1, %s783_s25  }
 0x30b   :  { %776 = dma.done.wait [#allocation4], 128  }
 0x30c   :  { %777 = vsyncadd [#allocation4], 4294967168 }
 0x30d   :  { %501 = vsyncpa [#allocation3], 1 }
 0x30e   :  { %502 = vsyncpa [#allocation6], 1 }
 0x30f   :  { %503 = vsyncpa [#allocation9], 1 }
 0x310   :  { %504 = vsyncpa [#allocation4], 1 }

</bundles_post_ra>
